<compile_context>
chip_gen: v7x
topology: tpu7x:2x2x1
jax: 0.10.0
libtpu: 0.0.40
codegen_flags: <defaults>
</compile_context>

<pallas_src>
import functools

import jax
import jax.numpy as jnp
from jax.experimental import pallas as pl
from jax.experimental.pallas import tpu as pltpu

_LANE = 128
_SUBLANE = 8


def _round_up(n, m):
    return ((n + m - 1) // m) * m


def _pad2(a, rows, cols):
    return jnp.pad(a, ((0, rows - a.shape[0]), (0, cols - a.shape[1])))


# ---------------------------------------------------------------------------
# Pallas kernel: whole ConditionedVAE forward (encoder + reparam + decoder)
# Operates on one batch tile; all feature dims are pre-padded to 128 multiples.
# Input slab layout  : [ y (dy_p) | x (dx_p) | eps (l_p) ]
# Output slab layout : [ y_hat (dy_p) | mean (l_p) | logvar (l_p) ]
# ---------------------------------------------------------------------------
def cvae_forward_kernel(
    in_ref,                           # packed [TB, dy_p + dx_p + l_p] input slab
    we1_ref, be1_ref,                 # encoder layer 1 (acts on concat([y | x]))
    wh_ref, bh_ref,                   # fused mean|logvar head: [H, 2L]
    wd1z_ref, wd1x_ref, bd1_ref,      # decoder layer 1 (split over [z | x])
    wd2_ref, bd2_ref,                 # decoder output layer
    out_ref,                          # packed [TB, dy_p + 2*l_p] output slab
    *, l_pad, dy_pad, dx_pad,
):
    wdt = we1_ref.dtype               # matmul operand dtype (f32 or bf16)

    blk = in_ref[...]
    yx = blk[:, : dy_pad + dx_pad]                    # encoder input
    x = blk[:, dy_pad: dy_pad + dx_pad]               # conditioning (decoder)
    eps = blk[:, dy_pad + dx_pad:]                    # reparam noise

    # ---- encoder: h = relu(concat([y, x]) @ We1 + be1) ----
    h = jnp.dot(yx.astype(wdt), we1_ref[...],
                preferred_element_type=jnp.float32) + be1_ref[...]
    h = jnp.maximum(h, 0.0)

    # ---- fused mean|logvar head: one matmul, slice lanes (128-aligned) ----
    head = jnp.dot(h.astype(wdt), wh_ref[...],
                   preferred_element_type=jnp.float32) + bh_ref[...]
    mean = head[:, :l_pad]
    logvar = head[:, l_pad:]

    # ---- reparameterization (f32 elementwise): z = mean + exp(0.5*logvar)*eps
    z = mean + jnp.exp(0.5 * logvar) * eps

    # ---- decoder: y_hat = relu(concat([z, x]) @ Wd1 + bd1) @ Wd2 + bd2 ----
    h2 = (
        jnp.dot(z.astype(wdt), wd1z_ref[...], preferred_element_type=jnp.float32)
        + jnp.dot(x.astype(wdt), wd1x_ref[...], preferred_element_type=jnp.float32)
        + bd1_ref[...]
    )
    h2 = jnp.maximum(h2, 0.0)
    y_hat = jnp.dot(h2.astype(wdt), wd2_ref[...],
                    preferred_element_type=jnp.float32) + bd2_ref[...]

    # ---- packed, lane-dense output stores (all slice starts 128-aligned) ----
    out_ref[:, :dy_pad] = y_hat
    out_ref[:, dy_pad:dy_pad + l_pad] = mean
    out_ref[:, dy_pad + l_pad:] = logvar


# ---------------------------------------------------------------------------
# Wrapper: padding, weight fusion, grid/BlockSpec setup, output unpacking
# ---------------------------------------------------------------------------
def conditioned_vae_forward(x, y, eps, params, *, block_b=256, use_bf16=False):
    """Fused forward. x:[B,Dx], y:[B,Dy], eps:[B,L] -> (y_hat, mean, logvar)."""
    (we1y, we1x, be1, wem, bem, wev, bev, wd1z, wd1x, bd1, wd2, bd2) = params

    B, Dx = x.shape
    _, Dy = y.shape
    L = eps.shape[1]
    H = we1y.shape[1]

    f32 = jnp.float32
    wdt = jnp.bfloat16 if use_bf16 else f32

    # Padded (lane-dense) feature dims and batch tiling.
    dy_p = _round_up(Dy, _LANE)
    dx_p = _round_up(Dx, _LANE)
    h_p = _round_up(H, _LANE)
    l_p = _round_up(L, _LANE)

    tb = _round_up(max(_SUBLANE, min(block_b, _round_up(B, _SUBLANE))), _SUBLANE)
    b_p = _round_up(B, tb)
    grid = (b_p // tb,)

    in_cols = dy_p + dx_p + l_p
    out_cols = dy_p + 2 * l_p

    # ---- pad inputs; pack into a single lane-dense slab [y | x | eps] ----
    in_slab = jnp.zeros((b_p, in_cols), f32)
    in_slab = in_slab.at[:B, :Dy].set(y.astype(f32))
    in_slab = in_slab.at[:B, dy_p:dy_p + Dx].set(x.astype(f32))
    in_slab = in_slab.at[:B, dy_p + dx_p:dy_p + dx_p + L].set(eps.astype(f32))

    # ---- fuse + zero-pad weights (padding is numerically inert) ----
    we1 = jnp.zeros((dy_p + dx_p, h_p), f32)
    we1 = we1.at[:Dy, :H].set(we1y)
    we1 = we1.at[dy_p:dy_p + Dx, :H].set(we1x)
    be1_p = _pad2(be1, 1, h_p)

    wh = jnp.zeros((h_p, 2 * l_p), f32)                     # [mean | logvar] head
    wh = wh.at[:H, :L].set(wem)
    wh = wh.at[:H, l_p:l_p + L].set(wev)
    bh = jnp.zeros((1, 2 * l_p), f32)
    bh = bh.at[:, :L].set(bem[0])
    bh = bh.at[:, l_p:l_p + L].set(bev[0])

    wd1z_p = _pad2(wd1z, l_p, h_p)
    wd1x_p = _pad2(wd1x, dx_p, h_p)
    bd1_p = _pad2(bd1, 1, h_p)
    wd2_p = _pad2(wd2, h_p, dy_p)
    bd2_p = _pad2(bd2, 1, dy_p)

    # Matmul operands may be bf16 (v6e/v7x MXU); biases stay f32.
    we1_c = we1.astype(wdt)
    wh_c = wh.astype(wdt)
    wd1z_c = wd1z_p.astype(wdt)
    wd1x_c = wd1x_p.astype(wdt)
    wd2_c = wd2_p.astype(wdt)

    # ---- BlockSpecs: batch-tiled activation slab, resident weights ----
    in_slab_spec = pl.BlockSpec((tb, in_cols), lambda i: (i, 0))
    out_spec = pl.BlockSpec((tb, out_cols), lambda i: (i, 0))

    def resident_spec(arr):
        return pl.BlockSpec(arr.shape, lambda i: (0, 0))

    in_specs = [
        in_slab_spec,
        resident_spec(we1_c), resident_spec(be1_p),
        resident_spec(wh_c), resident_spec(bh),
        resident_spec(wd1z_c), resident_spec(wd1x_c), resident_spec(bd1_p),
        resident_spec(wd2_c), resident_spec(bd2_p),
    ]

    # ---- VMEM budget: 2x double-buffered batch tiles + resident weights
    #      + f32 intermediates, with headroom; clamp to [32 MiB, 64 MiB] so it
    #      is valid on v7x (64 MiB physical) as well as v5e/v6e (128 MiB). ----
    def nbytes(a):
        return int(a.size) * a.dtype.itemsize

    in_tile_bytes = tb * in_cols * 4
    out_tile_bytes = tb * out_cols * 4
    weight_bytes = sum(nbytes(a) for a in
                       (we1_c, be1_p, wh_c, bh, wd1z_c, wd1x_c, bd1_p, wd2_c, bd2_p))
    interm_bytes = tb * (2 * h_p + 4 * l_p + dy_p) * 4
    vmem_needed = 2 * (in_tile_bytes + out_tile_bytes) + weight_bytes + interm_bytes
    vmem_limit = int(min(max(2 * vmem_needed, 32 * 1024 * 1024), 64 * 1024 * 1024))

    out = pl.pallas_call(
        functools.partial(cvae_forward_kernel, l_pad=l_p, dy_pad=dy_p, dx_pad=dx_p),
        out_shape=jax.ShapeDtypeStruct((b_p, out_cols), f32),
        grid=grid,
        in_specs=in_specs,
        out_specs=out_spec,
        compiler_params=pltpu.CompilerParams(
            dimension_semantics=("parallel",),
            vmem_limit_bytes=vmem_limit,
        ),
    )(in_slab, we1_c, be1_p, wh_c, bh, wd1z_c, wd1x_c, bd1_p, wd2_c, bd2_p)

    # ---- unpack the lane-dense output slab and drop padding ----
    y_hat = out[:B, :Dy]
    mean = out[:B, dy_p:dy_p + L]
    logvar = out[:B, dy_p + l_p:dy_p + l_p + L]
    return y_hat, mean, logvar


# ---------------------------------------------------------------------------
# Deterministic parameter init (synthetic; shapes implied by the MLP choice)
# ---------------------------------------------------------------------------
def init_params(key, dx, dy, hidden, latent):
    ks = jax.random.split(key, 8)

    def dense(k, fan_in, fan_out):
        w = jax.random.normal(k, (fan_in, fan_out), jnp.float32) / jnp.sqrt(fan_in)
        b = jnp.zeros((1, fan_out), jnp.float32)
        return w, b

    we1, be1 = dense(ks[0], dy + dx, hidden)       # acts on concat([y, x])
    we1y, we1x = we1[:dy], we1[dy:]
    wem, bem = dense(ks[1], hidden, latent)
    wev, bev = dense(ks[2], hidden, latent)
    wd1, bd1 = dense(ks[3], latent + dx, hidden)   # acts on concat([z, x])
    wd1z, wd1x = wd1[:latent], wd1[latent:]
    wd2, bd2 = dense(ks[4], hidden, dy)

    return (we1y, we1x, be1, wem, bem, wev, bev, wd1z, wd1x, bd1, wd2, bd2)


# ---------------------------------------------------------------------------
# Pure-JAX reference for correctness check
# ---------------------------------------------------------------------------
def reference_forward(x, y, eps, params):
    (we1y, we1x, be1, wem, bem, wev, bev, wd1z, wd1x, bd1, wd2, bd2) = params
    h = jnp.maximum(y @ we1y + x @ we1x + be1, 0.0)
    mean = h @ wem + bem
    logvar = h @ wev + bev
    z = mean + jnp.exp(0.5 * logvar) * eps
    h2 = jnp.maximum(z @ wd1z + x @ wd1x + bd1, 0.0)
    y_hat = h2 @ wd2 + bd2
    return y_hat, mean, logvar


if __name__ == "__main__":
    B, Dx, Dy, H, L = 8, 16, 16, 32, 8

    key = jax.random.PRNGKey(0)
    k_x, k_y, k_eps, k_p = jax.random.split(key, 4)

    x = jax.random.normal(k_x, (B, Dx), jnp.float32)      # conditioning input
    y = jax.random.normal(k_y, (B, Dy), jnp.float32)      # target to reconstruct
    eps = jax.random.normal(k_eps, (B, L), jnp.float32)   # reparam noise
    params = init_params(k_p, Dx, Dy, H, L)

    # f32 path (exact vs reference)
    y_hat, mean, logvar = conditioned_vae_forward(x, y, eps, params)
    jax.block_until_ready((y_hat, mean, logvar))

    ref_y_hat, ref_mean, ref_logvar = reference_forward(x, y, eps, params)
    assert y_hat.shape == (B, Dy) and mean.shape == (B, L) and logvar.shape == (B, L)
    assert jnp.allclose(y_hat, ref_y_hat, atol=1e-5, rtol=1e-5)
    assert jnp.allclose(mean, ref_mean, atol=1e-5, rtol=1e-5)
    assert jnp.allclose(logvar, ref_logvar, atol=1e-5, rtol=1e-5)

    # bf16 matmul-operand path (v6e/v7x MXU) — loose tolerance sanity check
    y_hat_b, mean_b, logvar_b = conditioned_vae_forward(
        x, y, eps, params, use_bf16=True)
    jax.block_until_ready((y_hat_b, mean_b, logvar_b))
    assert jnp.allclose(y_hat_b, ref_y_hat, atol=0.2, rtol=0.2)
    assert jnp.allclose(mean_b, ref_mean, atol=0.2, rtol=0.2)
    assert jnp.allclose(logvar_b, ref_logvar, atol=0.2, rtol=0.2)

    print("KERNEL_OK")
</pallas_src>

<mosaic_0001>
module attributes {stable_mosaic.version = 11 : i64} {
  func.func @cvae_forward_kernel(%arg0: i32, %arg1: memref<8x384xf32, #tpu.memory_space<vmem>>, %arg2: memref<256x128xf32, #tpu.memory_space<vmem>>, %arg3: memref<1x128xf32, #tpu.memory_space<vmem>>, %arg4: memref<128x256xf32, #tpu.memory_space<vmem>>, %arg5: memref<1x256xf32, #tpu.memory_space<vmem>>, %arg6: memref<128x128xf32, #tpu.memory_space<vmem>>, %arg7: memref<128x128xf32, #tpu.memory_space<vmem>>, %arg8: memref<1x128xf32, #tpu.memory_space<vmem>>, %arg9: memref<128x128xf32, #tpu.memory_space<vmem>>, %arg10: memref<1x128xf32, #tpu.memory_space<vmem>>, %arg11: memref<8x384xf32, #tpu.memory_space<vmem>>) attributes {dimension_semantics = [#tpu.dimension_semantics<parallel>], iteration_bounds = array<i64: 1>, scalar_prefetch = 0 : i64, scratch_operands = 0 : i64, tpu.core_type = #tpu.core_type<tc>, window_params = [{transform_indices = @transform_0, window_bounds = array<i64: 8, 384>}, {pipeline_mode = #tpu.pipeline_mode<synchronous>, transform_indices = @transform_1, window_bounds = array<i64: 256, 128>}, {pipeline_mode = #tpu.pipeline_mode<synchronous>, transform_indices = @transform_2, window_bounds = array<i64: 1, 128>}, {pipeline_mode = #tpu.pipeline_mode<synchronous>, transform_indices = @transform_3, window_bounds = array<i64: 128, 256>}, {pipeline_mode = #tpu.pipeline_mode<synchronous>, transform_indices = @transform_4, window_bounds = array<i64: 1, 256>}, {pipeline_mode = #tpu.pipeline_mode<synchronous>, transform_indices = @transform_5, window_bounds = array<i64: 128, 128>}, {pipeline_mode = #tpu.pipeline_mode<synchronous>, transform_indices = @transform_6, window_bounds = array<i64: 128, 128>}, {pipeline_mode = #tpu.pipeline_mode<synchronous>, transform_indices = @transform_7, window_bounds = array<i64: 1, 128>}, {pipeline_mode = #tpu.pipeline_mode<synchronous>, transform_indices = @transform_8, window_bounds = array<i64: 128, 128>}, {pipeline_mode = #tpu.pipeline_mode<synchronous>, transform_indices = @transform_9, window_bounds = array<i64: 1, 128>}, {transform_indices = @transform_10, window_bounds = array<i64: 8, 384>}]} {
    %c0 = arith.constant 0 : index
    %c0_0 = arith.constant 0 : index
    %0 = vector.load %arg1[%c0, %c0_0] : memref<8x384xf32, #tpu.memory_space<vmem>>, vector<8x384xf32>
    %1 = vector.extract_strided_slice %0 {offsets = [0, 0], sizes = [8, 256], strides = [1, 1]} : vector<8x384xf32> to vector<8x256xf32>
    %2 = vector.extract_strided_slice %0 {offsets = [0, 128], sizes = [8, 128], strides = [1, 1]} : vector<8x384xf32> to vector<8x128xf32>
    %3 = vector.extract_strided_slice %0 {offsets = [0, 256], sizes = [8, 128], strides = [1, 1]} : vector<8x384xf32> to vector<8x128xf32>
    %c0_1 = arith.constant 0 : index
    %c0_2 = arith.constant 0 : index
    %4 = vector.load %arg2[%c0_1, %c0_2] : memref<256x128xf32, #tpu.memory_space<vmem>>, vector<256x128xf32>
    %cst = arith.constant dense<0.000000e+00> : vector<8x128xf32>
    %5 = tpu.matmul %1, %4, %cst {dimension_numbers = #tpu.dot_dimension_numbers<[1], [0], [0], [1], [0, 0, 1, 1], [], []>} : vector<8x256xf32>, vector<256x128xf32>, vector<8x128xf32> -> vector<8x128xf32>
    %c0_3 = arith.constant 0 : index
    %c0_4 = arith.constant 0 : index
    %6 = vector.load %arg3[%c0_3, %c0_4] : memref<1x128xf32, #tpu.memory_space<vmem>>, vector<1x128xf32>
    %7 = vector.broadcast %6 : vector<1x128xf32> to vector<8x128xf32>
    %8 = arith.addf %5, %7 : vector<8x128xf32>
    %cst_5 = arith.constant 0.000000e+00 : f32
    %9 = vector.broadcast %cst_5 : f32 to vector<8x128xf32>
    %10 = arith.maximumf %8, %9 : vector<8x128xf32>
    %c0_6 = arith.constant 0 : index
    %c0_7 = arith.constant 0 : index
    %11 = vector.load %arg4[%c0_6, %c0_7] : memref<128x256xf32, #tpu.memory_space<vmem>>, vector<128x256xf32>
    %cst_8 = arith.constant dense<0.000000e+00> : vector<8x256xf32>
    %12 = tpu.matmul %10, %11, %cst_8 {dimension_numbers = #tpu.dot_dimension_numbers<[1], [0], [0], [1], [0, 0, 1, 1], [], []>} : vector<8x128xf32>, vector<128x256xf32>, vector<8x256xf32> -> vector<8x256xf32>
    %c0_9 = arith.constant 0 : index
    %c0_10 = arith.constant 0 : index
    %13 = vector.load %arg5[%c0_9, %c0_10] : memref<1x256xf32, #tpu.memory_space<vmem>>, vector<1x256xf32>
    %14 = vector.broadcast %13 : vector<1x256xf32> to vector<8x256xf32>
    %15 = arith.addf %12, %14 : vector<8x256xf32>
    %16 = vector.extract_strided_slice %15 {offsets = [0, 0], sizes = [8, 128], strides = [1, 1]} : vector<8x256xf32> to vector<8x128xf32>
    %17 = vector.extract_strided_slice %15 {offsets = [0, 128], sizes = [8, 128], strides = [1, 1]} : vector<8x256xf32> to vector<8x128xf32>
    %cst_11 = arith.constant 5.000000e-01 : f32
    %18 = vector.broadcast %cst_11 : f32 to vector<8x128xf32>
    %19 = arith.mulf %18, %17 : vector<8x128xf32>
    %20 = math.exp %19 : vector<8x128xf32>
    %21 = arith.mulf %20, %3 : vector<8x128xf32>
    %22 = arith.addf %16, %21 : vector<8x128xf32>
    %c0_12 = arith.constant 0 : index
    %c0_13 = arith.constant 0 : index
    %23 = vector.load %arg6[%c0_12, %c0_13] : memref<128x128xf32, #tpu.memory_space<vmem>>, vector<128x128xf32>
    %cst_14 = arith.constant dense<0.000000e+00> : vector<8x128xf32>
    %24 = tpu.matmul %22, %23, %cst_14 {dimension_numbers = #tpu.dot_dimension_numbers<[1], [0], [0], [1], [0, 0, 1, 1], [], []>} : vector<8x128xf32>, vector<128x128xf32>, vector<8x128xf32> -> vector<8x128xf32>
    %c0_15 = arith.constant 0 : index
    %c0_16 = arith.constant 0 : index
    %25 = vector.load %arg7[%c0_15, %c0_16] : memref<128x128xf32, #tpu.memory_space<vmem>>, vector<128x128xf32>
    %cst_17 = arith.constant dense<0.000000e+00> : vector<8x128xf32>
    %26 = tpu.matmul %2, %25, %cst_17 {dimension_numbers = #tpu.dot_dimension_numbers<[1], [0], [0], [1], [0, 0, 1, 1], [], []>} : vector<8x128xf32>, vector<128x128xf32>, vector<8x128xf32> -> vector<8x128xf32>
    %27 = arith.addf %24, %26 : vector<8x128xf32>
    %c0_18 = arith.constant 0 : index
    %c0_19 = arith.constant 0 : index
    %28 = vector.load %arg8[%c0_18, %c0_19] : memref<1x128xf32, #tpu.memory_space<vmem>>, vector<1x128xf32>
    %29 = vector.broadcast %28 : vector<1x128xf32> to vector<8x128xf32>
    %30 = arith.addf %27, %29 : vector<8x128xf32>
    %cst_20 = arith.constant 0.000000e+00 : f32
    %31 = vector.broadcast %cst_20 : f32 to vector<8x128xf32>
    %32 = arith.maximumf %30, %31 : vector<8x128xf32>
    %c0_21 = arith.constant 0 : index
    %c0_22 = arith.constant 0 : index
    %33 = vector.load %arg9[%c0_21, %c0_22] : memref<128x128xf32, #tpu.memory_space<vmem>>, vector<128x128xf32>
    %cst_23 = arith.constant dense<0.000000e+00> : vector<8x128xf32>
    %34 = tpu.matmul %32, %33, %cst_23 {dimension_numbers = #tpu.dot_dimension_numbers<[1], [0], [0], [1], [0, 0, 1, 1], [], []>} : vector<8x128xf32>, vector<128x128xf32>, vector<8x128xf32> -> vector<8x128xf32>
    %c0_24 = arith.constant 0 : index
    %c0_25 = arith.constant 0 : index
    %35 = vector.load %arg10[%c0_24, %c0_25] : memref<1x128xf32, #tpu.memory_space<vmem>>, vector<1x128xf32>
    %36 = vector.broadcast %35 : vector<1x128xf32> to vector<8x128xf32>
    %37 = arith.addf %34, %36 : vector<8x128xf32>
    %c0_26 = arith.constant 0 : index
    %c0_27 = arith.constant 0 : index
    %38 = vector.load %arg11[%c0_26, %c0_27] : memref<8x384xf32, #tpu.memory_space<vmem>>, vector<8x128xf32>
    tpu.vector_store %arg11[%c0_26, %c0_27], %37 {strides = array<i32>} : memref<8x384xf32, #tpu.memory_space<vmem>>, vector<8x128xf32>,
    %c0_28 = arith.constant 0 : index
    %c128 = arith.constant 128 : index
    %39 = vector.load %arg11[%c0_28, %c128] : memref<8x384xf32, #tpu.memory_space<vmem>>, vector<8x128xf32>
    tpu.vector_store %arg11[%c0_28, %c128], %16 {strides = array<i32>} : memref<8x384xf32, #tpu.memory_space<vmem>>, vector<8x128xf32>,
    %c0_29 = arith.constant 0 : index
    %c256 = arith.constant 256 : index
    %40 = vector.load %arg11[%c0_29, %c256] : memref<8x384xf32, #tpu.memory_space<vmem>>, vector<8x128xf32>
    tpu.vector_store %arg11[%c0_29, %c256], %17 {strides = array<i32>} : memref<8x384xf32, #tpu.memory_space<vmem>>, vector<8x128xf32>,
    return
  }
  func.func @transform_0(%arg0: i32) -> (i32, i32) {
    %c0_i32 = arith.constant 0 : i32
    %c0_i32_0 = arith.constant 0 : i32
    return %arg0, %c0_i32 : i32, i32
  }
  func.func @transform_1(%arg0: i32) -> (i32, i32) {
    %c0_i32 = arith.constant 0 : i32
    %c0_i32_0 = arith.constant 0 : i32
    %c0_i32_1 = arith.constant 0 : i32
    return %c0_i32, %c0_i32_0 : i32, i32
  }
  func.func @transform_2(%arg0: i32) -> (i32, i32) {
    %c0_i32 = arith.constant 0 : i32
    %c0_i32_0 = arith.constant 0 : i32
    %c0_i32_1 = arith.constant 0 : i32
    return %c0_i32, %c0_i32_0 : i32, i32
  }
  func.func @transform_3(%arg0: i32) -> (i32, i32) {
    %c0_i32 = arith.constant 0 : i32
    %c0_i32_0 = arith.constant 0 : i32
    %c0_i32_1 = arith.constant 0 : i32
    return %c0_i32, %c0_i32_0 : i32, i32
  }
  func.func @transform_4(%arg0: i32) -> (i32, i32) {
    %c0_i32 = arith.constant 0 : i32
    %c0_i32_0 = arith.constant 0 : i32
    %c0_i32_1 = arith.constant 0 : i32
    return %c0_i32, %c0_i32_0 : i32, i32
  }
  func.func @transform_5(%arg0: i32) -> (i32, i32) {
    %c0_i32 = arith.constant 0 : i32
    %c0_i32_0 = arith.constant 0 : i32
    %c0_i32_1 = arith.constant 0 : i32
    return %c0_i32, %c0_i32_0 : i32, i32
  }
  func.func @transform_6(%arg0: i32) -> (i32, i32) {
    %c0_i32 = arith.constant 0 : i32
    %c0_i32_0 = arith.constant 0 : i32
    %c0_i32_1 = arith.constant 0 : i32
    return %c0_i32, %c0_i32_0 : i32, i32
  }
  func.func @transform_7(%arg0: i32) -> (i32, i32) {
    %c0_i32 = arith.constant 0 : i32
    %c0_i32_0 = arith.constant 0 : i32
    %c0_i32_1 = arith.constant 0 : i32
    return %c0_i32, %c0_i32_0 : i32, i32
  }
  func.func @transform_8(%arg0: i32) -> (i32, i32) {
    %c0_i32 = arith.constant 0 : i32
    %c0_i32_0 = arith.constant 0 : i32
    %c0_i32_1 = arith.constant 0 : i32
    return %c0_i32, %c0_i32_0 : i32, i32
  }
  func.func @transform_9(%arg0: i32) -> (i32, i32) {
    %c0_i32 = arith.constant 0 : i32
    %c0_i32_0 = arith.constant 0 : i32
    %c0_i32_1 = arith.constant 0 : i32
    return %c0_i32, %c0_i32_0 : i32, i32
  }
  func.func @transform_10(%arg0: i32) -> (i32, i32) {
    %c0_i32 = arith.constant 0 : i32
    %c0_i32_0 = arith.constant 0 : i32
    return %arg0, %c0_i32 : i32, i32
  }
}

</mosaic_0001>

<bundles_post_ra>
// kernel: tpu_custom_call.1
= control target key start
LH: loop header
LB: loop body
LE: loop exit
PB: predicated region body
PF: predicated region fallthrough
CT: control target
= control target key end

     0   :  { %15 = vsyncpa [#allocation3], 0  ;;  %s1373_s0 = inlined_call_operand.hbm [shape: f32[8,384], index: 0, kind: input, shape index: {}]   ;;  %s1374_s1 = inlined_call_operand.hbm [shape: f32[256,128], index: 1, kind: input, shape index: {}]   ;;  %s1375_s2 = inlined_call_operand.vmem [shape: f32[1,128], index: 2, kind: input, shape index: {}]   ;;  %s1376_s3 = inlined_call_operand.hbm [shape: f32[128,256], index: 3, kind: input, shape index: {}]   ;;  %s1377_s4 = inlined_call_operand.vmem [shape: f32[1,256], index: 4, kind: input, shape index: {}]   ;;  %s1378_s5 = inlined_call_operand.hbm [shape: f32[128,128], index: 5, kind: input, shape index: {}]   ;;  %s1379_s6 = inlined_call_operand.hbm [shape: f32[128,128], index: 6, kind: input, shape index: {}]   ;;  %s1380_s7 = inlined_call_operand.vmem [shape: f32[1,128], index: 7, kind: input, shape index: {}]   ;;  %s1381_s8 = inlined_call_operand.hbm [shape: f32[128,128], index: 8, kind: input, shape index: {}]   ;;  %s1382_s9 = inlined_call_operand.vmem [shape: f32[1,128], index: 9, kind: input, shape index: {}]   ;;  %s1383_s10 = inlined_call_operand.hbm [shape: f32[8,384], index: 10, kind: output, shape index: {}]  }
   0x1   :  { %16 = vsyncpa [#allocation6], 0 }
   0x2   :  { %17 = vsyncpa [#allocation9], 0 }
   0x3   :  { %18 = vsyncpa [#allocation12], 0 }
   0x4   :  { %19 = vsyncpa [#allocation4], 0  ;;  %s1154_s13 = smov [#allocation5]   ;;  %s990_s17 = scalar_lea.hbm %s1374_s1, 4096 }
   0x5   :  { %s35_s14 = sshll.u32 %s1154_s13, 4  ;;  %p991_p0 = scmp.ne.s32.totalorder %s1374_s1, %s990_s17  ;;  %s36_s14 = int_to_ptr.vmem [resolvable:$true] %s35_s14 }
   0x6   :  { %p994_p1 = scmp.lt.u32.totalorder %s990_s17, %s1374_s1 }
   0x8   :  { %p996_p2 = pnand %p994_p1, %p991_p0 }
   0xa   :  { %999 = shalt.err (!%p996_p2)
}
   0xb   :  { %s1000_s22 = scalar_lea.vmem %s36_s14, 4096  ;;  %p1005_p4 = scmp.lt.s32.totalorder %s36_s14, %s36_s14 }
   0xc   :  { %p1001_p3 = scmp.ne.s32.totalorder %s36_s14, %s1000_s22  ;;  %p1006_p5 = scmp.lt.s32.totalorder %s1000_s22, %s1000_s22 }
   0xe   :  { %p1007_p6 = por %p1006_p5, %p1005_p4 }
  0x10   :  { %p1008_p7 = pnand %p1007_p6, %p1001_p3 }
  0x12   :  { %1011 = shalt.err (!%p1008_p7)
}
  0x13   :  { %s1155_s23 = smov 128   ;;  %s1156_s24 = smov 8  }
  0x14   :  { %41 = dma.hbm_to_vmem [thread:$0]  %s1374_s1, 4096, %s36_s14, [#allocation6], %s1155_s23, %s1155_s23, %s1156_s24  }
  0x15   :  { %s1157_s27 = smov [#allocation8]   ;;  %s1158_s29 = smov [#allocation2]  }
  0x16   :  { %s63_s28 = sshll.u32 %s1157_s27, 4  ;;  %s26_s30 = sshll.u32 %s1158_s29, 4  ;;  %s64_s28 = int_to_ptr.vmem [resolvable:$true] %s63_s28  ;;  %s27_s30 = int_to_ptr.vmem [resolvable:$true] %s26_s30 }
  0x17   :  { %s1012_s13 = scalar_lea.hbm %s1378_s5, 2048 }
  0x18   :  { %p1013_p8 = scmp.ne.s32.totalorder %s1378_s5, %s1012_s13  ;;  %p1016_p9 = scmp.lt.u32.totalorder %s1012_s13, %s1378_s5 }
  0x1a   :  { %p1018_p10 = pnand %p1016_p9, %p1013_p8 }
  0x1c   :  { %1021 = shalt.err (!%p1018_p10)
}
  0x1d   :  { %s1022_s1 = scalar_lea.vmem %s64_s28, 2048  ;;  %p1027_p12 = scmp.lt.s32.totalorder %s64_s28, %s64_s28 }
  0x1e   :  { %p1023_p11 = scmp.ne.s32.totalorder %s64_s28, %s1022_s1  ;;  %p1028_p13 = scmp.lt.s32.totalorder %s1022_s1, %s1022_s1 }
  0x20   :  { %p1029_p0 = por %p1028_p13, %p1027_p12 }
  0x22   :  { %p1030_p1 = pnand %p1029_p0, %p1023_p11 }
  0x24   :  { %1033 = shalt.err (!%p1030_p1)
}
  0x25   :  { %69 = dma.hbm_to_vmem [thread:$0]  %s1378_s5, 2048, %s64_s28, [#allocation9], %s1155_s23, %s1155_s23, %s1156_s24  }
  0x26   :  { %s1034_s22 = scalar_lea.hbm %s1373_s0, 384 }
  0x27   :  { %p1035_p2 = scmp.ne.s32.totalorder %s1373_s0, %s1034_s22  ;;  %p1038_p3 = scmp.lt.u32.totalorder %s1034_s22, %s1373_s0 }
  0x29   :  { %p1040_p4 = pnand %p1038_p3, %p1035_p2 }
  0x2b   :  { %1043 = shalt.err (!%p1040_p4)
}
  0x2c   :  { %s1044_s11 = scalar_lea.vmem %s27_s30, 384  ;;  %p1049_p6 = scmp.lt.s32.totalorder %s27_s30, %s27_s30 }
  0x2d   :  { %p1045_p5 = scmp.ne.s32.totalorder %s27_s30, %s1044_s11  ;;  %p1050_p7 = scmp.lt.s32.totalorder %s1044_s11, %s1044_s11 }
  0x2f   :  { %p1051_p8 = por %p1050_p7, %p1049_p6 }
  0x31   :  { %p1052_p9 = pnand %p1051_p8, %p1045_p5 }
  0x33   :  { %1055 = shalt.err (!%p1052_p9)
}
  0x34   :  { %29 = dma.hbm_to_vmem [thread:$0]  %s1373_s0, 384, %s27_s30, [#allocation3]  }
  0x35   :  { %s1159_s12 = smov [#allocation7]   ;;  %s1056_s17 = scalar_lea.hbm %s1376_s3, 4096 }
  0x36   :  { %s49_s13 = sshll.u32 %s1159_s12, 4  ;;  %p1057_p10 = scmp.ne.s32.totalorder %s1376_s3, %s1056_s17  ;;  %s50_s13 = int_to_ptr.vmem [resolvable:$true] %s49_s13 }
  0x37   :  { %p1060_p11 = scmp.lt.u32.totalorder %s1056_s17, %s1376_s3 }
  0x39   :  { %p1062_p12 = pnand %p1060_p11, %p1057_p10 }
  0x3b   :  { %1065 = shalt.err (!%p1062_p12)
}
  0x3c   :  { %s1066_s20 = scalar_lea.vmem %s50_s13, 4096  ;;  %p1071_p0 = scmp.lt.s32.totalorder %s50_s13, %s50_s13 }
  0x3d   :  { %p1067_p13 = scmp.ne.s32.totalorder %s50_s13, %s1066_s20  ;;  %p1072_p1 = scmp.lt.s32.totalorder %s1066_s20, %s1066_s20 }
  0x3f   :  { %p1073_p2 = por %p1072_p1, %p1071_p0 }
  0x41   :  { %p1074_p3 = pnand %p1073_p2, %p1067_p13 }
  0x43   :  { %1077 = shalt.err (!%p1074_p3)
}
  0x44   :  { %s1160_s0 = smov 256   ;;  %s1161_s30 = smov 16  }
  0x45   :  { %55 = dma.hbm_to_vmem [thread:$0]  %s1376_s3, 4096, %s50_s13, [#allocation6], %s1160_s0, %s1160_s0, %s1161_s30  }
  0x46   :  { %s1162_s25 = smov [#allocation10]   ;;  %s1163_s27 = smov [#allocation11]  }
  0x47   :  { %s75_s26 = sshll.u32 %s1162_s25, 4  ;;  %s89_s29 = sshll.u32 %s1163_s27, 4  ;;  %s76_s26 = int_to_ptr.vmem [resolvable:$true] %s75_s26  ;;  %s1277_s29 = int_to_ptr.vmem [resolvable:$true] %s89_s29 }
  0x48   :  { %s1078_s28 = scalar_lea.hbm %s1379_s6, 2048 }
  0x49   :  { %p1079_p4 = scmp.ne.s32.totalorder %s1379_s6, %s1078_s28  ;;  %p1082_p5 = scmp.lt.u32.totalorder %s1078_s28, %s1379_s6 }
  0x4b   :  { %p1084_p6 = pnand %p1082_p5, %p1079_p4 }
  0x4d   :  { %1087 = shalt.err (!%p1084_p6)
}
  0x4e   :  { %s1088_s3 = scalar_lea.vmem %s76_s26, 2048  ;;  %p1093_p8 = scmp.lt.s32.totalorder %s76_s26, %s76_s26 }
  0x4f   :  { %p1089_p7 = scmp.ne.s32.totalorder %s76_s26, %s1088_s3  ;;  %p1094_p9 = scmp.lt.s32.totalorder %s1088_s3, %s1088_s3 }
  0x51   :  { %p1095_p10 = por %p1094_p9, %p1093_p8 }
  0x53   :  { %p1096_p11 = pnand %p1095_p10, %p1089_p7 }
  0x55   :  { %1099 = shalt.err (!%p1096_p11)
}
  0x56   :  { %81 = dma.hbm_to_vmem [thread:$0]  %s1379_s6, 2048, %s76_s26, [#allocation9], %s1155_s23, %s1155_s23, %s1156_s24  }
  0x57   :  { %s1100_s19 = scalar_lea.hbm %s1381_s8, 2048 }
  0x58   :  { %p1101_p12 = scmp.ne.s32.totalorder %s1381_s8, %s1100_s19  ;;  %p1104_p13 = scmp.lt.u32.totalorder %s1100_s19, %s1381_s8 }
  0x5a   :  { %p1106_p0 = pnand %p1104_p13, %p1101_p12 }
  0x5c   :  { %1109 = shalt.err (!%p1106_p0)
}
  0x5d   :  { %s1110_s22 = scalar_lea.vmem %s1277_s29, 2048  ;;  %p1115_p2 = scmp.lt.s32.totalorder %s1277_s29, %s1277_s29 }
  0x5e   :  { %p1111_p1 = scmp.ne.s32.totalorder %s1277_s29, %s1110_s22  ;;  %p1116_p3 = scmp.lt.s32.totalorder %s1110_s22, %s1110_s22 }
  0x60   :  { %p1117_p4 = por %p1116_p3, %p1115_p2 }
  0x62   :  { %p1118_p5 = pnand %p1117_p4, %p1111_p1 }
  0x64   :  { %1121 = shalt.err (!%p1118_p5)
}
  0x65   :  { %95 = dma.hbm_to_vmem [thread:$0]  %s1381_s8, 2048, %s1277_s29, [#allocation12], %s1155_s23, %s1155_s23, %s1156_s24  }
  0x66   :  { %1144 = dma.done.wait [#allocation3], 384  }
  0x67   :  { %1145 = vsyncadd [#allocation3], 4294966912 }
  0x68   :  { %1146 = dma.done.wait [#allocation6], 8192  }
  0x69   :  { %1147 = vsyncadd [#allocation6], 4294959104 }
  0x6a   :  { %1148 = dma.done.wait [#allocation9], 4096  }
  0x6b   :  { %1149 = vsyncadd [#allocation9], 4294963200 }
  0x6c   :  { %1150 = dma.done.wait [#allocation12], 2048  }
  0x6d   :  { %1151 = vsyncadd [#allocation12], 4294965248  ;;  %v135_v0 = vld [vmem:[#allocation5 + $0x80] sm:$0xff]  ;;  %v136_v1 = vld [vmem:[#allocation5 + $0x88] sm:$0xff]  ;;  %vm1166_vm0 = vmmov 0   ;;  %s1167_s11 = smov [#allocation13]  }
  0x6e   :  { %v119_v2 = vld [vmem:[#allocation5] sm:$0xff]  ;;  %v838_v3 = vpack.c.bf16 %v136_v1, %v135_v0  ;;  %v120_v4 = vld [vmem:[#allocation5 + $0x8] sm:$0xff]  ;;  %v137_v5 = vld [vmem:[#allocation5 + $0x90] sm:$0xff]  ;;  %s632_s5 = sshll.u32 %s1167_s11, 4  ;;  %s633_s5 = int_to_ptr.vmem [resolvable:$true] %s632_s5 }
  0x6f   :  { %v138_v6 = vld [vmem:[#allocation5 + $0x98] sm:$0xff]  ;;  %v840_v7 = vpack.c.bf16 %v120_v4, %v119_v2  ;;  %v121_v9 = vld [vmem:[#allocation5 + $0x10] sm:$0xff]  ;;  %v139_v11 = vld [vmem:[#allocation5 + $0xa0] sm:$0xff]  ;;  %s1122_s28 = scalar_lea.vmem %s633_s5, 384  ;;  %p1127_p7 = scmp.lt.s32.totalorder %s633_s5, %s633_s5 }
  0x70   :  { %v842_v8 = vpack.c.bf16 %v138_v6, %v137_v5  ;;  %v122_v10 = vld [vmem:[#allocation5 + $0x18] sm:$0xff]  ;;  %839 = vmatprep.subr.bf16.mxu0 %v838_v3  ;;  %v140_v12 = vld [vmem:[#allocation5 + $0xa8] sm:$0xff]  ;;  %v123_v15 = vld [vmem:[#allocation5 + $0x20] sm:$0xff]  ;;  %p1123_p6 = scmp.ne.s32.totalorder %s633_s5, %s1122_s28  ;;  %p1128_p8 = scmp.lt.s32.totalorder %s1122_s28, %s1122_s28 }
  0x71   :  { %841 = vmatpush3.bf16.msra.mxu0 %v840_v7  ;;  %v844_v13 = vpack.c.bf16 %v122_v10, %v121_v9  ;;  %v846_v14 = vpack.c.bf16 %v140_v12, %v139_v11  ;;  %v124_v16 = vld [vmem:[#allocation5 + $0x28] sm:$0xff]  ;;  %v141_v17 = vld [vmem:[#allocation5 + $0xb0] sm:$0xff]  ;;  %v142_v18 = vld [vmem:[#allocation5 + $0xb8] sm:$0xff] }
  0x72   :  { %843 = vmatprep.subr.bf16.mxu0 %v842_v8  ;;  %v848_v19 = vpack.c.bf16 %v124_v16, %v123_v15  ;;  %v850_v20 = vpack.c.bf16 %v142_v18, %v141_v17  ;;  %v125_v21 = vld [vmem:[#allocation5 + $0x30] sm:$0xff]  ;;  %v126_v22 = vld [vmem:[#allocation5 + $0x38] sm:$0xff]  ;;  %v143_v23 = vld [vmem:[#allocation5 + $0xc0] sm:$0xff]  ;;  %p1129_p9 = por %p1128_p8, %p1127_p7 }
  0x73   :  { %v144_v24 = vld [vmem:[#allocation5 + $0xc8] sm:$0xff]  ;;  %v1314_v25 = vld [vmem:[#allocation2 + $0x8] sm:$0xff]  ;;  %v127_v26 = vld [vmem:[#allocation5 + $0x40] sm:$0xff]  ;;  %v852_v30 = vpack.c.bf16 %v126_v22, %v125_v21 }
  0x74   :  { %v128_v27 = vld [vmem:[#allocation5 + $0x48] sm:$0xff]  ;;  %222 = vmatprep.mubr.f32.mxu0 %v1314_v25  ;;  %v232_v29 = vld [vmem:[#allocation7 + $0x18] sm:$0xff]  ;;  %v145_v31 = vld [vmem:[#allocation5 + $0xd0] sm:$0xff]  ;;  %v854_v36 = vpack.c.bf16 %v144_v24, %v143_v23  ;;  %p1130_p10 = pnand %p1129_p9, %p1123_p6 }
  0x75   :  { %845 = vmatpush3.bf16.msra.mxu0 %v844_v13  ;;  %v230_v28 = vld [vmem:[#allocation7 + $0x8] sm:$0xff]  ;;  %v229_v33 = vld [vmem:[#allocation7] sm:$0xff]  ;;  %v231_v34 = vld [vmem:[#allocation7 + $0x10] sm:$0xff]  ;;  %v856_v46 = vpack.c.bf16 %v128_v27, %v127_v26 }
  0x76   :  { %847 = vmatprep.subr.bf16.mxu0 %v846_v14  ;;  %v870_v32 = vpack.c.bf16 %v232_v29, %v230_v28  ;;  %v234_v35 = vld [vmem:[#allocation7 + $0x28] sm:$0xff]  ;;  %v872_v37 = vpack.c.bf16 %v231_v34, %v229_v33  ;;  %v236_v38 = vld [vmem:[#allocation7 + $0x38] sm:$0xff]  ;;  %v233_v39 = vld [vmem:[#allocation7 + $0x20] sm:$0xff] }
  0x77   :  { %v235_v40 = vld [vmem:[#allocation7 + $0x30] sm:$0xff]  ;;  %v146_v41 = vld [vmem:[#allocation5 + $0xd8] sm:$0xff]  ;;  %v874_v42 = vpack.c.bf16 %v236_v38, %v234_v35  ;;  %v238_v43 = vld [vmem:[#allocation7 + $0x48] sm:$0xff]  ;;  %v1164_v35 = vmov 0.0   ;;  %v1165_v38 = vmov 0.0|0.0  }
  0x78   :  { %871 = vmatprep.subr.bf16.mxu1 %v870_v32  ;;  %v240_v44 = vld [vmem:[#allocation7 + $0x58] sm:$0xff]  ;;  %v876_v45 = vpack.c.bf16 %v235_v40, %v233_v39  ;;  %v129_v47 = vld [vmem:[#allocation5 + $0x50] sm:$0xff]  ;;  %v237_v49 = vld [vmem:[#allocation7 + $0x40] sm:$0xff]  ;;  %v858_v51 = vpack.c.bf16 %v146_v41, %v145_v31  ;;  %337 = vmatprep.mubr.f32.mxu1 %v1164_v35 }
  0x79   :  { %849 = vmatpush3.bf16.msra.mxu0 %v848_v19  ;;  %873 = vmatpush1.bf16.msra.mxu1 %v872_v37  ;;  %v878_v48 = vpack.c.bf16 %v240_v44, %v238_v43  ;;  %v239_v50 = vld [vmem:[#allocation7 + $0x50] sm:$0xff]  ;;  %v130_v52 = vld [vmem:[#allocation5 + $0x58] sm:$0xff]  ;;  %v242_v53 = vld [vmem:[#allocation7 + $0x68] sm:$0xff] }
  0x7a   :  { %851 = vmatprep.subr.bf16.mxu0 %v850_v20  ;;  %875 = vmatprep.subr.bf16.mxu1 %v874_v42  ;;  %v244_v54 = vld [vmem:[#allocation7 + $0x78] sm:$0xff]  ;;  %v147_v55 = vld [vmem:[#allocation5 + $0xe0] sm:$0xff]  ;;  %v148_v56 = vld [vmem:[#allocation5 + $0xe8] sm:$0xff]  ;;  %v880_v57 = vpack.c.bf16 %v239_v50, %v237_v49  ;;  %v860_v58 = vpack.c.bf16 %v130_v52, %v129_v47 }
  0x7b   :  { %v131_v59 = vld [vmem:[#allocation5 + $0x60] sm:$0xff]  ;;  %v882_v60 = vpack.c.bf16 %v244_v54, %v242_v53  ;;  %v243_v62 = vld [vmem:[#allocation7 + $0x70] sm:$0xff]  ;;  %v862_v63 = vpack.c.bf16 %v148_v56, %v147_v55  ;;  %v132_v0 = vld [vmem:[#allocation5 + $0x68] sm:$0xff] }
  0x7c   :  { %v241_v61 = vld [vmem:[#allocation7 + $0x60] sm:$0xff]  ;;  %v246_v1 = vld [vmem:[#allocation7 + $0x88] sm:$0xff]  ;;  %v248_v2 = vld [vmem:[#allocation7 + $0x98] sm:$0xff]  ;;  %v864_v6 = vpack.c.bf16 %v132_v0, %v131_v59 }
  0x7d   :  { %853 = vmatpush3.bf16.msra.mxu0 %v852_v30  ;;  %877 = vmatpush1.bf16.msra.mxu1 %v876_v45  ;;  %v149_v3 = vld [vmem:[#allocation5 + $0xf0] sm:$0xff]  ;;  %v150_v4 = vld [vmem:[#allocation5 + $0xf8] sm:$0xff]  ;;  %v884_v5 = vpack.c.bf16 %v243_v62, %v241_v61  ;;  %v886_v8 = vpack.c.bf16 %v248_v2, %v246_v1  ;;  %v245_v9 = vld [vmem:[#allocation7 + $0x80] sm:$0xff] }
  0x7e   :  { %855 = vmatprep.subr.bf16.mxu0 %v854_v36  ;;  %879 = vmatprep.subr.bf16.mxu1 %v878_v48  ;;  %v133_v7 = vld [vmem:[#allocation5 + $0x70] sm:$0xff]  ;;  %v866_v11 = vpack.c.bf16 %v150_v4, %v149_v3  ;;  %v134_v12 = vld [vmem:[#allocation5 + $0x78] sm:$0xff]  ;;  %v250_v13 = vld [vmem:[#allocation7 + $0xa8] sm:$0xff] }
  0x7f   :  { %v247_v10 = vld [vmem:[#allocation7 + $0x90] sm:$0xff]  ;;  %v252_v14 = vld [vmem:[#allocation7 + $0xb8] sm:$0xff]  ;;  %v868_v16 = vpack.c.bf16 %v134_v12, %v133_v7  ;;  %v249_v18 = vld [vmem:[#allocation7 + $0xa0] sm:$0xff] }
  0x80   :  { %v888_v15 = vpack.c.bf16 %v247_v10, %v245_v9  ;;  %v890_v17 = vpack.c.bf16 %v252_v14, %v250_v13  ;;  %v251_v19 = vld [vmem:[#allocation7 + $0xb0] sm:$0xff]  ;;  %v116_v21 = vld [vmem:[#allocation2] sm:$0xff]  ;;  %v256_v23 = vld [vmem:[#allocation7 + $0xd8] sm:$0xff] }
  0x81   :  { %857 = vmatpush3.bf16.msra.mxu0 %v856_v46  ;;  %881 = vmatpush1.bf16.msra.mxu1 %v880_v57  ;;  %v892_v20 = vpack.c.bf16 %v251_v19, %v249_v18  ;;  %v254_v22 = vld [vmem:[#allocation7 + $0xc8] sm:$0xff]  ;;  %v253_v26 = vld [vmem:[#allocation7 + $0xc0] sm:$0xff]  ;;  %v255_v27 = vld [vmem:[#allocation7 + $0xd0] sm:$0xff] }
  0x82   :  { %859 = vmatprep.subr.bf16.mxu0 %v858_v51  ;;  %883 = vmatprep.subr.bf16.mxu1 %v882_v60  ;;  %v894_v24 = vpack.c.bf16 %v256_v23, %v254_v22  ;;  %v896_v28 = vpack.c.bf16 %v255_v27, %v253_v26  ;;  %v258_v29 = vld [vmem:[#allocation7 + $0xe8] sm:$0xff]  ;;  %v260_v30 = vld [vmem:[#allocation7 + $0xf8] sm:$0xff]  ;;  %v257_v32 = vld [vmem:[#allocation7 + $0xe0] sm:$0xff] }
  0x83   :  { %v898_v31 = vpack.c.bf16 %v260_v30, %v258_v29  ;;  %v259_v33 = vld [vmem:[#allocation7 + $0xf0] sm:$0xff]  ;;  %v365_v36 = vld [vmem:[#allocation10] sm:$0xff]  ;;  %v366_v37 = vld [vmem:[#allocation10 + $0x8] sm:$0xff] }
  0x84   :  { %v900_v34 = vpack.c.bf16 %v259_v33, %v257_v32  ;;  %v903_v39 = vpack.c.bf16 %v366_v37, %v365_v36  ;;  %v367_v40 = vld [vmem:[#allocation10 + $0x10] sm:$0xff]  ;;  %v368_v41 = vld [vmem:[#allocation10 + $0x18] sm:$0xff]  ;;  %v369_v43 = vld [vmem:[#allocation10 + $0x20] sm:$0xff] }
  0x85   :  { %861 = vmatpush3.bf16.msra.mxu0 %v860_v58  ;;  %885 = vmatpush1.bf16.msra.mxu1 %v884_v5  ;;  %v906_v42 = vpack.c.bf16 %v368_v41, %v367_v40  ;;  %v370_v44 = vld [vmem:[#allocation10 + $0x28] sm:$0xff]  ;;  %v349_v50 = vld [vmem:[#allocation8] sm:$0xff]  ;;  %v351_v55 = vld [vmem:[#allocation8 + $0x10] sm:$0xff] }
  0x86   :  { %863 = vmatprep.subr.bf16.mxu0 %v862_v63  ;;  %887 = vmatprep.subr.bf16.mxu1 %v886_v8  ;;  %v909_v45 = vpack.c.bf16 %v370_v44, %v369_v43  ;;  %v644_v47 = vld [vmem:[%s1375_s2] ss:$0 sm:$0xff]  ;;  %v352_v56 = vld [vmem:[#allocation8 + $0x18] sm:$0xff]  ;;  %v353_v58 = vld [vmem:[#allocation8 + $0x20] sm:$0xff] }
  0x87   :  { %v350_v51 = vld [vmem:[#allocation8 + $0x8] sm:$0xff]  ;;  %v930_v57 = vpack.c.bf16 %v352_v56, %v351_v55  ;;  %v371_v61 = vld [vmem:[#allocation10 + $0x30] sm:$0xff]  ;;  %v372_v62 = vld [vmem:[#allocation10 + $0x38] sm:$0xff] }
  0x88   :  { %v927_v53 = vpack.c.bf16 %v350_v51, %v349_v50  ;;  %v354_v59 = vld [vmem:[#allocation8 + $0x28] sm:$0xff]  ;;  %v912_v63 = vpack.c.bf16 %v372_v62, %v371_v61  ;;  %v355_v0 = vld [vmem:[#allocation8 + $0x30] sm:$0xff]  ;;  %v356_v1 = vld [vmem:[#allocation8 + $0x38] sm:$0xff] }
  0x89   :  { %865 = vmatpush3.bf16.msra.mxu0 %v864_v6  ;;  %889 = vmatpush1.bf16.msra.mxu1 %v888_v15  ;;  %v933_v60 = vpack.c.bf16 %v354_v59, %v353_v58  ;;  %v936_v2 = vpack.c.bf16 %v356_v1, %v355_v0  ;;  %v373_v3 = vld [vmem:[#allocation10 + $0x40] sm:$0xff]  ;;  %v374_v4 = vld [vmem:[#allocation10 + $0x48] sm:$0xff]  ;;  %v375_v9 = vld [vmem:[#allocation10 + $0x50] sm:$0xff] }
  0x8a   :  { %867 = vmatprep.subr.bf16.mxu0 %v866_v11  ;;  %891 = vmatprep.subr.bf16.mxu1 %v890_v17  ;;  %v915_v5 = vpack.c.bf16 %v374_v4, %v373_v3  ;;  %v357_v6 = vld [vmem:[#allocation8 + $0x40] sm:$0xff]  ;;  %v358_v7 = vld [vmem:[#allocation8 + $0x48] sm:$0xff]  ;;  %v376_v10 = vld [vmem:[#allocation10 + $0x58] sm:$0xff] }
  0x8b   :  { %v939_v8 = vpack.c.bf16 %v358_v7, %v357_v6  ;;  %v359_v11 = vld [vmem:[#allocation8 + $0x50] sm:$0xff]  ;;  %v918_v12 = vpack.c.bf16 %v376_v10, %v375_v9  ;;  %v360_v13 = vld [vmem:[#allocation8 + $0x58] sm:$0xff]  ;;  %v377_v14 = vld [vmem:[#allocation10 + $0x60] sm:$0xff] }
  0x8c   :  { %v378_v15 = vld [vmem:[#allocation10 + $0x68] sm:$0xff]  ;;  %v361_v17 = vld [vmem:[#allocation8 + $0x60] sm:$0xff]  ;;  %v380_v22 = vld [vmem:[#allocation10 + $0x78] sm:$0xff] }
  0x8d   :  { %869 = vmatpush3.bf16.msra.mxu0 %v868_v16  ;;  %893 = vmatpush1.bf16.msra.mxu1 %v892_v20  ;;  %v942_v16 = vpack.c.bf16 %v360_v13, %v359_v11  ;;  %v362_v18 = vld [vmem:[#allocation8 + $0x68] sm:$0xff]  ;;  %v921_v19 = vpack.c.bf16 %v378_v15, %v377_v14  ;;  %v363_v23 = vld [vmem:[#allocation8 + $0x70] sm:$0xff]  ;;  %v533_v32 = vld [vmem:[#allocation11 + $0x18] sm:$0xff] }
  0x8e   :  { %895 = vmatprep.subr.bf16.mxu1 %v894_v24  ;;  %902 = vmatprep.subr.bf16.mxu0 %v1165_v38  ;;  %v945_v20 = vpack.c.bf16 %v362_v18, %v361_v17  ;;  %v364_v24 = vld [vmem:[#allocation8 + $0x78] sm:$0xff]  ;;  %v531_v29 = vld [vmem:[#allocation11 + $0x8] sm:$0xff]  ;;  %v532_v30 = vld [vmem:[#allocation11 + $0x10] sm:$0xff] }
  0x8f   :  { %v948_v27 = vpack.c.bf16 %v364_v24, %v363_v23  ;;  %v954_v33 = vpack.c.bf16 %v533_v32, %v532_v30  ;;  %v535_v36 = vld [vmem:[#allocation11 + $0x28] sm:$0xff]  ;;  %v538_v41 = vld [vmem:[#allocation11 + $0x40] sm:$0xff]  ;;  %v540_v43 = vld [vmem:[#allocation11 + $0x50] sm:$0xff] }
  0x90   :  { %223 = vmatmul.mubr.f32.vlgmr.msra.gmra.mrb[0].mxu0 %v116_v21  ;;  %v379_v21 = vld [vmem:[#allocation10 + $0x70] sm:$0xff]  ;;  %v541_v44 = vld [vmem:[#allocation11 + $0x58] sm:$0xff]  ;;  %v543_v0 = vld [vmem:[#allocation11 + $0x68] sm:$0xff] }
  0x91   :  { %897 = vmatpush1.bf16.msra.mxu1 %v896_v28  ;;  %904 = vmatpush3.bf16.msra.mxu0 %v903_v39  ;;  %v924_v26 = vpack.c.bf16 %v380_v22, %v379_v21  ;;  %v530_v28 = vld [vmem:[#allocation11] sm:$0xff]  ;;  %v536_v39 = vld [vmem:[#allocation11 + $0x30] sm:$0xff]  ;;  %v118_v59 = vld [vmem:[#allocation2 + $0x10] sm:$0xff] }
  0x92   :  { %899 = vmatprep.subr.bf16.mxu1 %v898_v31  ;;  %905 = vmatprep.subr.bf16.mxu0 %v1165_v38  ;;  %v951_v31 = vpack.c.bf16 %v531_v29, %v530_v28  ;;  %v544_v4 = vld [vmem:[#allocation11 + $0x70] sm:$0xff]  ;;  %v646_v13 = vld [vmem:[%s1382_s9] ss:$0 sm:$0xff] }
  0x93   :  { %765 = vmatprep.mubr.msk.f32.mxu0 %vm1166_vm0, %v1164_v35 }
  0x95   :  { %901 = vmatpush1.bf16.msra.mxu1 %v900_v34  ;;  %907 = vmatpush3.bf16.msra.mxu0 %v906_v42  ;;  %v534_v34 = vld [vmem:[#allocation11 + $0x20] sm:$0xff] }
  0x96   :  { %926 = vmatprep.subr.bf16.mxu1 %v1165_v38  ;;  %908 = vmatprep.subr.bf16.mxu0 %v1165_v38  ;;  %v957_v37 = vpack.c.bf16 %v535_v36, %v534_v34 }
  0x99   :  { %910 = vmatpush3.bf16.msra.mxu0 %v909_v45  ;;  %v966_v45 = vpack.c.bf16 %v541_v44, %v540_v43 }
  0x9a   :  { %911 = vmatprep.subr.bf16.mxu0 %v1165_v38 }
  0x9d   :  { %913 = vmatpush3.bf16.msra.mxu0 %v912_v63  ;;  %v542_v63 = vld [vmem:[#allocation11 + $0x60] sm:$0xff] }
  0x9e   :  { %914 = vmatprep.subr.bf16.mxu0 %v1165_v38  ;;  %v969_v1 = vpack.c.bf16 %v543_v0, %v542_v63 }
  0xa1   :  { %916 = vmatpush3.bf16.msra.mxu0 %v915_v5  ;;  %v545_v5 = vld [vmem:[#allocation11 + $0x78] sm:$0xff] }
  0xa2   :  { %917 = vmatprep.subr.bf16.mxu0 %v1165_v38  ;;  %v972_v6 = vpack.c.bf16 %v545_v5, %v544_v4 }
  0xa5   :  { %919 = vmatpush3.bf16.msra.mxu0 %v918_v12 }
  0xa6   :  { %920 = vmatprep.subr.bf16.mxu0 %v1165_v38 }
  0xa9   :  { %922 = vmatpush3.bf16.msra.mxu0 %v921_v19 }
  0xaa   :  { %923 = vmatprep.subr.bf16.mxu0 %v1165_v38 }
  0xad   :  { %925 = vmatpush3.bf16.msra.mxu0 %v924_v26 }
  0xae   :  { %950 = vmatprep.subr.bf16.mxu0 %v1165_v38 }
  0xb0   :  { %766 = vmatmul.mubr.f32.vlgmr.msra.gmra.mrb[2].mxu0 %v1314_v25  ;;  %v537_v25 = vld [vmem:[#allocation11 + $0x38] sm:$0xff] }
  0xb1   :  { %835 = vmatprep.mubr.msk.f32.mxu0 %vm1166_vm0, %v1164_v35  ;;  %952 = vmatpush3.bf16.msra.mxu0 %v951_v31  ;;  %v960_v40 = vpack.c.bf16 %v537_v25, %v536_v39 }
  0xb2   :  { %953 = vmatprep.subr.bf16.mxu0 %v1165_v38 }
  0xb5   :  { %955 = vmatpush3.bf16.msra.mxu0 %v954_v33 }
  0xb6   :  { %956 = vmatprep.subr.bf16.mxu0 %v1165_v38 }
  0xb9   :  { %958 = vmatpush3.bf16.msra.mxu0 %v957_v37 }
  0xba   :  { %959 = vmatprep.subr.bf16.mxu0 %v1165_v38 }
  0xbd   :  { %961 = vmatpush3.bf16.msra.mxu0 %v960_v40 }
  0xbe   :  { %962 = vmatprep.subr.bf16.mxu0 %v1165_v38 }
 0x163   :  { %v679_v46 = vpop.f32.mrb[0].mxu0 }
 0x164   :  { %v680_v48 = vpop.f32.mrb[1].mxu0 }
 0x165   :  { %v681_v49 = vadd.f32 %v680_v48, %v679_v46  ;;  %v263_v46 = vlaneseq }
 0x167   :  { %v225_v52 = vadd.f32 %v681_v49, %v644_v47  ;;  %v264_v47 = vshrl.u32 %v263_v46, 7  ;;  %v261_v49 = vld [vmem:[%s1377_s4] sm:$0x3] }
 0x169   :  { %v228_v54 = vmax.f32 %v225_v52, 0.0  ;;  %v265_v48 = vsub.s32 0, %v264_v47  ;;  %v269_v50 = vsub.s32 1, %v264_v47 }
 0x16b   :  { %338 = vmatmul.mubr.f32.vlgmr.msra.gmra.mrb[0].mxu1 %v228_v54  ;;  %v266_v51 = vrot.slane %v261_v49, %v265_v48  ;;  %v270_v52 = vrot.slane %v261_v49, %v269_v50 }
 0x16c   :  { %928 = vmatpush3.bf16.msra.mxu1 %v927_v53  ;;  %800 = vmatprep.mubr.msk.f32.mxu1 %vm1166_vm0, %v1164_v35  ;;  %v539_v35 = vld [vmem:[#allocation11 + $0x48] sm:$0xff] }
 0x16d   :  { %929 = vmatprep.subr.bf16.mxu1 %v1165_v38  ;;  %v963_v42 = vpack.c.bf16 %v539_v35, %v538_v41 }
 0x16f   :  { %964 = vmatpush3.bf16.msra.mxu0 %v963_v42 }
 0x170   :  { %931 = vmatpush3.bf16.msra.mxu1 %v930_v57  ;;  %965 = vmatprep.subr.bf16.mxu0 %v1165_v38 }
 0x171   :  { %932 = vmatprep.subr.bf16.mxu1 %v1165_v38 }
 0x173   :  { %967 = vmatpush3.bf16.msra.mxu0 %v966_v45 }
 0x174   :  { %934 = vmatpush3.bf16.msra.mxu1 %v933_v60  ;;  %968 = vmatprep.subr.bf16.mxu0 %v1165_v38 }
 0x175   :  { %935 = vmatprep.subr.bf16.mxu1 %v1165_v38 }
 0x177   :  { %970 = vmatpush3.bf16.msra.mxu0 %v969_v1 }
 0x178   :  { %937 = vmatpush3.bf16.msra.mxu1 %v936_v2  ;;  %971 = vmatprep.subr.bf16.mxu0 %v1165_v38 }
 0x179   :  { %938 = vmatprep.subr.bf16.mxu1 %v1165_v38 }
 0x17b   :  { %973 = vmatpush3.bf16.msra.mxu0 %v972_v6 }
 0x17c   :  { %940 = vmatpush3.bf16.msra.mxu1 %v939_v8  ;;  %v645_v8 = vld [vmem:[%s1380_s7] ss:$0 sm:$0xff] }
 0x17d   :  { %941 = vmatprep.subr.bf16.mxu1 %v1165_v38 }
 0x180   :  { %943 = vmatpush3.bf16.msra.mxu1 %v942_v16 }
 0x181   :  { %944 = vmatprep.subr.bf16.mxu1 %v1165_v38 }
 0x183   :  { %v447_v2 = vpop.f32.mrb[2].mxu0 }
 0x184   :  { %946 = vmatpush3.bf16.msra.mxu1 %v945_v20  ;;  %v767_v3 = vpop.f32.mrb[3].mxu0 }
 0x185   :  { %947 = vmatprep.subr.bf16.mxu1 %v1165_v38 }
 0x188   :  { %949 = vmatpush3.bf16.msra.mxu1 %v948_v27 }
 0x23e   :  { %v339_v53 = vpop.f32.mrb[0].mxu1 }
 0x23f   :  { %v340_v54 = vadd.f32 %v339_v53, %v266_v51  ;;  %v341_v55 = vpop.f32.mrb[1].mxu1 }
 0x240   :  { %v342_v56 = vadd.f32 %v341_v55, %v270_v52 }
 0x241   :  { %624 = vst [vmem:[#allocation13 + $0x8] sm:$0xff] %v340_v54 }
 0x242   :  { %v344_v57 = vmul.f32 0.5, %v342_v56  ;;  %625 = vst [vmem:[#allocation13 + $0x10] sm:$0xff] %v342_v56 }
 0x244   :  { %v345_v58 = vmul.f32 1.442695, %v344_v57 }
 0x246   :  { %988 = vpow2.f32 %v345_v58 }
 0x250   :  { %v989_v60 = vpop.eup %988 }
 0x251   :  { %v347_v61 = vmul.f32 %v989_v60, %v118_v59 }
 0x253   :  { %v348_v62 = vadd.f32 %v347_v61, %v340_v54 }
 0x255   :  { %801 = vmatmul.mubr.f32.vlgmr.msra.gmra.mrb[2].mxu1 %v348_v62 }
 0x328   :  { %v517_v7 = vpop.f32.mrb[2].mxu1 }
 0x329   :  { %v518_v9 = vadd.f32 %v517_v7, %v447_v2  ;;  %v802_v10 = vpop.f32.mrb[3].mxu1 }
 0x32b   :  { %v528_v11 = vadd.f32 %v645_v8, %v518_v9 }
 0x32d   :  { %v529_v12 = vmax.f32 %v528_v11, 0.0 }
 0x32f   :  { %836 = vmatmul.mubr.f32.vlgmr.msra.gmra.mrb[4].mxu0 %v529_v12 }
 0x402   :  { %v619_v38 = vpop.f32.mrb[4].mxu0 }
 0x403   :  { %v620_v14 = vadd.f32 %v646_v13, %v619_v38  ;;  %v837_v15 = vpop.f32.mrb[5].mxu0 }
 0x405   :  { %623 = vst [vmem:[#allocation13] sm:$0xff] %v620_v14 }
 0x406   :  { %1133 = shalt.err (!%p1130_p10)
}
 0x407   :  { %s1134_s15 = scalar_lea.hbm %s1383_s10, 384 }
 0x408   :  { %p1135_p11 = scmp.ne.s32.totalorder %s1383_s10, %s1134_s15  ;;  %p1138_p12 = scmp.lt.u32.totalorder %s1134_s15, %s1383_s10 }
 0x40a   :  { %p1140_p13 = pnand %p1138_p12, %p1135_p11 }
 0x40c   :  { %1143 = shalt.err (!%p1140_p13)
}
 0x40d   :  { %635 = dma.vmem_to_hbm [thread:$0]  %s633_s5, 384, %s1383_s10, [#allocation4]  }
 0x40e   :  { %1152 = dma.done.wait [#allocation4], 384  }
 0x40f   :  { %1153 = vsyncadd [#allocation4], 4294966912 }
 0x410   :  { %639 = vsyncpa [#allocation3], 1 }
 0x411   :  { %640 = vsyncpa [#allocation6], 1 }
 0x412   :  { %641 = vsyncpa [#allocation9], 1 }
 0x413   :  { %642 = vsyncpa [#allocation12], 1 }
 0x414   :  { %643 = vsyncpa [#allocation4], 1 }

</bundles_post_ra>
